<compile_context>
chip_gen: v7x
topology: tpu7x:2x2x1
jax: 0.10.0
libtpu: 0.0.40
codegen_flags: <defaults>
</compile_context>

<pallas_src>
import functools

import jax
import jax.numpy as jnp
from jax.experimental import pallas as pl
from jax.experimental.pallas import tpu as pltpu


def _round_up(x, m):
    return ((x + m - 1) // m) * m


def _query_vmem_capacity_bytes():
    # Per-TensorCore VMEM; fall back to the smallest modern part (v7x: 64 MiB).
    try:
        return int(pltpu.get_tpu_info().vmem_capacity_bytes)
    except Exception:
        return 64 * 1024 * 1024


_VMEM_CAP = _query_vmem_capacity_bytes()


def _footprint_bytes(tm, tf, idim_p, cbytes, obytes):
    """Approximate VMEM footprint of one pipelined grid step (2-deep buffers)."""
    fp = 0
    fp += 2 * tm * idim_p * cbytes      # x row tile (double-buffered)
    fp += 2 * idim_p * tf * cbytes      # w1 chunk
    fp += 2 * tf * idim_p * cbytes      # w2 chunk
    fp += 2 * 1 * tf * 4                # b1 (f32)
    fp += 2 * 1 * idim_p * 4            # b2 (f32)
    fp += 2 * tm * idim_p * obytes      # output tile
    fp += tm * idim_p * 4               # f32 accumulator scratch
    return fp


def _ff_kernel(x_ref, w1_ref, b1_ref, w2_ref, b2_ref, o_ref, acc_ref):
    # grid = (row_tiles, ff_tiles); the ffdim axis (last, "arbitrary") is a
    # reduction into the f32 accumulator scratch.
    #   x_ref:  (tm, idim_p)       row tile (resident across the ff axis)
    #   w1_ref: (idim_p, tf)       weight chunk (resident if tf == ff_p)
    #   b1_ref: (1, tf)   f32
    #   w2_ref: (tf, idim_p)       weight chunk
    #   b2_ref: (1, idim_p) f32
    #   o_ref:  (tm, idim_p)       lane-dense output tile
    #   acc_ref:(tm, idim_p) f32   accumulator (resident across ff axis)
    f = pl.program_id(1)

    @pl.when(f == 0)
    def _():
        # Seed the accumulator with the output bias: saves a broadcast + VPU
        # add on the critical final step.
        acc_ref[...] = jnp.broadcast_to(
            b2_ref[...].astype(jnp.float32), acc_ref.shape)

    # First matmul chunk (bf16 in, f32 out) + bias + ReLU in f32 (correct on
    # v5e which has no bf16 VPU).  Dropout == identity (eval semantics).
    h = jnp.dot(x_ref[...], w1_ref[...], preferred_element_type=jnp.float32)
    h = jnp.maximum(h + b1_ref[...], 0.0)

    # Second matmul chunk: cast h down to the weight dtype (bf16 by default)
    # so both matmuls run at MXU bf16 peak; accumulate in f32.
    acc_ref[...] += jnp.dot(h.astype(w2_ref.dtype), w2_ref[...],
                            preferred_element_type=jnp.float32)

    @pl.when(f == pl.num_programs(1) - 1)
    def _():
        o_ref[...] = acc_ref[...].astype(o_ref.dtype)


def _maybe_pad(a, pads):
    # Shapes are static under jit: elide the pad (an HBM copy) when it's a no-op.
    if all(lo == 0 and hi == 0 for lo, hi in pads):
        return a
    return jnp.pad(a, pads)


@functools.partial(jax.jit, static_argnames=("tm", "tf", "compute_dtype"))
def feed_forward(x, w1, b1, w2, b2, *, tm=None, tf=None,
                 compute_dtype=jnp.bfloat16):
    """x: [..., idim] -> [..., idim]  (fused Linear->Dropout(id)->ReLU->Linear)."""
    idim = x.shape[-1]
    ffdim = w1.shape[-1]
    lead = x.shape[:-1]
    x2 = x.reshape(-1, idim)
    n = x2.shape[0]

    cbytes = jnp.dtype(compute_dtype).itemsize
    obytes = jnp.dtype(x.dtype).itemsize

    # Lane-dense feature padding (multiples of 128) -> unmasked vector stores
    # and clean (8,128) block shapes.  Zero padding is exact through
    # matmul + bias(0) + ReLU.
    idim_p = _round_up(idim, 128)
    ff_base = _round_up(ffdim, 128)

    vmem_budget = int(_VMEM_CAP * 0.75)   # headroom for compiler scratch/spill

    # Row tile: large enough to be MXU-bound on weight streaming
    # (arithmetic intensity ~= tm flop/byte in bf16).
    tm_pref = tm if tm is not None else (1024 if _VMEM_CAP >= 100 * 2**20 else 512)
    # ff chunk: default to the full hidden dim -> weights become VMEM-resident
    # (constant block index across row tiles => DMA'd once) when they fit.
    tf_pref = tf if tf is not None else ff_base

    tm_eff = _round_up(min(tm_pref, _round_up(n, 8)), 8)
    tf_eff = _round_up(min(tf_pref, ff_base), 128)

    # Shrink tiles until the pipelined footprint fits the VMEM budget.
    while _footprint_bytes(tm_eff, tf_eff, idim_p, cbytes, obytes) > vmem_budget:
        if tf_eff > 512:
            tf_eff = _round_up(tf_eff // 2, 128)
        elif tm_eff > 128:
            tm_eff = max(128, _round_up(tm_eff // 2, 8))
        elif tf_eff > 128:
            tf_eff = _round_up(tf_eff // 2, 128)
        elif tm_eff > 8:
            tm_eff = max(8, _round_up(tm_eff // 2, 8))
        else:
            break

    n_p = _round_up(n, tm_eff)
    ff_p = _round_up(ff_base, tf_eff)

    # bf16 datapath for the matmuls; biases stay f32 for the epilogue.
    # (For repeated calls, cast/pad the weights once outside this function.)
    x2c = x2.astype(compute_dtype)
    w1c = w1.astype(compute_dtype)
    w2c = w2.astype(compute_dtype)
    b1f = b1.astype(jnp.float32).reshape(1, ffdim)
    b2f = b2.astype(jnp.float32).reshape(1, idim)

    x2p = _maybe_pad(x2c, ((0, n_p - n), (0, idim_p - idim)))
    w1p = _maybe_pad(w1c, ((0, idim_p - idim), (0, ff_p - ffdim)))
    b1p = _maybe_pad(b1f, ((0, 0), (0, ff_p - ffdim)))
    w2p = _maybe_pad(w2c, ((0, ff_p - ffdim), (0, idim_p - idim)))
    b2p = _maybe_pad(b2f, ((0, 0), (0, idim_p - idim)))

    grid = (n_p // tm_eff, ff_p // tf_eff)

    footprint = _footprint_bytes(tm_eff, tf_eff, idim_p, cbytes, obytes)
    vmem_limit = min(int(_VMEM_CAP * 0.85),
                     max(footprint + (4 << 20), 32 << 20))

    out2 = pl.pallas_call(
        _ff_kernel,
        out_shape=jax.ShapeDtypeStruct((n_p, idim_p), x.dtype),
        grid_spec=pltpu.PrefetchScalarGridSpec(
            num_scalar_prefetch=0,
            grid=grid,
            in_specs=[
                pl.BlockSpec((tm_eff, idim_p), lambda i, f: (i, 0)),   # x rows
                pl.BlockSpec((idim_p, tf_eff), lambda i, f: (0, f)),   # w1 chunk
                pl.BlockSpec((1, tf_eff), lambda i, f: (0, f)),        # b1 chunk
                pl.BlockSpec((tf_eff, idim_p), lambda i, f: (f, 0)),   # w2 chunk
                pl.BlockSpec((1, idim_p), lambda i, f: (0, 0)),        # b2
            ],
            out_specs=pl.BlockSpec((tm_eff, idim_p), lambda i, f: (i, 0)),
            scratch_shapes=[pltpu.VMEM((tm_eff, idim_p), jnp.float32)],
        ),
        compiler_params=pltpu.CompilerParams(
            # rows -> parallel (v7x: 2 TCs split row tiles);
            # ffdim -> reduction into the accumulator -> arbitrary (last axis).
            dimension_semantics=("parallel", "arbitrary"),
            vmem_limit_bytes=int(vmem_limit),
        ),
    )(x2p, w1p, b1p, w2p, b2p)

    return out2[:n, :idim].reshape(*lead, idim)


def init_params(key, idim, ffdim, dtype=jnp.float32):
    """Deterministic init mimicking nn.Linear's uniform(-1/sqrt(fan_in), ...)."""
    k1, k2, k3, k4 = jax.random.split(key, 4)
    lim1 = 1.0 / jnp.sqrt(idim)
    lim2 = 1.0 / jnp.sqrt(ffdim)
    w1 = jax.random.uniform(k1, (idim, ffdim), dtype, -lim1, lim1)
    b1 = jax.random.uniform(k2, (ffdim,), dtype, -lim1, lim1)
    w2 = jax.random.uniform(k3, (ffdim, idim), dtype, -lim2, lim2)
    b2 = jax.random.uniform(k4, (idim,), dtype, -lim2, lim2)
    return w1, b1, w2, b2


if __name__ == "__main__":
    batch, seq, idim, ffdim = 2, 8, 32, 64
    key = jax.random.PRNGKey(0)
    kx, kp = jax.random.split(key)

    x = jax.random.normal(kx, (batch, seq, idim), jnp.float32)
    w1, b1, w2, b2 = init_params(kp, idim, ffdim)

    # plain-JAX reference (f32)
    ref = jnp.maximum(x @ w1 + b1, 0.0) @ w2 + b2

    # Default path: bf16 MXU datapath, f32 accumulation.
    out = jax.block_until_ready(feed_forward(x, w1, b1, w2, b2))
    assert out.shape == x.shape
    assert jnp.allclose(out, ref, atol=5e-2, rtol=5e-2)

    # f32 datapath: tight numerical check of the tiling / accumulation logic.
    out_f32 = jax.block_until_ready(
        feed_forward(x, w1, b1, w2, b2, compute_dtype=jnp.float32))
    assert jnp.allclose(out_f32, ref, atol=1e-5, rtol=1e-5)

    print("KERNEL_OK")
</pallas_src>

<mosaic_0001>
module attributes {stable_mosaic.version = 11 : i64} {
  func.func @_ff_kernel(%arg0: i32, %arg1: i32, %arg2: memref<16x128xbf16, #tpu.memory_space<vmem>>, %arg3: memref<128x128xbf16, #tpu.memory_space<vmem>>, %arg4: memref<1x128xf32, #tpu.memory_space<vmem>>, %arg5: memref<128x128xbf16, #tpu.memory_space<vmem>>, %arg6: memref<1x128xf32, #tpu.memory_space<vmem>>, %arg7: memref<16x128xf32, #tpu.memory_space<vmem>>, %arg8: memref<16x128xf32, #tpu.memory_space<vmem>>) attributes {dimension_semantics = [#tpu.dimension_semantics<parallel>, #tpu.dimension_semantics<arbitrary>], iteration_bounds = array<i64: 1, 1>, scalar_prefetch = 0 : i64, scratch_operands = 1 : i64, tpu.core_type = #tpu.core_type<tc>, window_params = [{transform_indices = @transform_0, window_bounds = array<i64: 16, 128>}, {transform_indices = @transform_1, window_bounds = array<i64: 128, 128>}, {transform_indices = @transform_2, window_bounds = array<i64: 1, 128>}, {transform_indices = @transform_3, window_bounds = array<i64: 128, 128>}, {pipeline_mode = #tpu.pipeline_mode<synchronous>, transform_indices = @transform_4, window_bounds = array<i64: 1, 128>}, {transform_indices = @transform_5, window_bounds = array<i64: 16, 128>}]} {
    %c0_i32 = arith.constant 0 : i32
    %0 = arith.cmpi eq, %arg1, %c0_i32 : i32
    %1 = arith.extui %0 : i1 to i32
    %c0_i32_0 = arith.constant 0 : i32
    %2 = arith.cmpi ne, %1, %c0_i32_0 : i32
    scf.if %2 {
      %c0_16 = arith.constant 0 : index
      %c0_17 = arith.constant 0 : index
      %20 = vector.load %arg6[%c0_16, %c0_17] : memref<1x128xf32, #tpu.memory_space<vmem>>, vector<1x128xf32>
      %21 = vector.shape_cast %20 : vector<1x128xf32> to vector<1x128xf32>
      %22 = vector.broadcast %21 : vector<1x128xf32> to vector<16x128xf32>
      %c0_18 = arith.constant 0 : index
      %c0_19 = arith.constant 0 : index
      %23 = vector.load %arg8[%c0_18, %c0_19] : memref<16x128xf32, #tpu.memory_space<vmem>>, vector<16x128xf32>
      tpu.vector_store %arg8[%c0_18, %c0_19], %22 {strides = array<i32>} : memref<16x128xf32, #tpu.memory_space<vmem>>, vector<16x128xf32>,
    } else {
    }
    %c0 = arith.constant 0 : index
    %c0_1 = arith.constant 0 : index
    %3 = vector.load %arg2[%c0, %c0_1] : memref<16x128xbf16, #tpu.memory_space<vmem>>, vector<16x128xbf16>
    %c0_2 = arith.constant 0 : index
    %c0_3 = arith.constant 0 : index
    %4 = vector.load %arg3[%c0_2, %c0_3] : memref<128x128xbf16, #tpu.memory_space<vmem>>, vector<128x128xbf16>
    %cst = arith.constant dense<0.000000e+00> : vector<16x128xf32>
    %5 = tpu.matmul %3, %4, %cst {dimension_numbers = #tpu.dot_dimension_numbers<[1], [0], [0], [1], [0, 0, 1, 1], [], []>} : vector<16x128xbf16>, vector<128x128xbf16>, vector<16x128xf32> -> vector<16x128xf32>
    %c0_4 = arith.constant 0 : index
    %c0_5 = arith.constant 0 : index
    %6 = vector.load %arg4[%c0_4, %c0_5] : memref<1x128xf32, #tpu.memory_space<vmem>>, vector<1x128xf32>
    %7 = vector.broadcast %6 : vector<1x128xf32> to vector<16x128xf32>
    %8 = arith.addf %5, %7 : vector<16x128xf32>
    %cst_6 = arith.constant 0.000000e+00 : f32
    %9 = vector.broadcast %cst_6 : f32 to vector<16x128xf32>
    %10 = arith.maximumf %8, %9 : vector<16x128xf32>
    %c0_7 = arith.constant 0 : index
    %c0_8 = arith.constant 0 : index
    %11 = vector.load %arg8[%c0_7, %c0_8] : memref<16x128xf32, #tpu.memory_space<vmem>>, vector<16x128xf32>
    %12 = arith.truncf %10 : vector<16x128xf32> to vector<16x128xbf16>
    %c0_9 = arith.constant 0 : index
    %c0_10 = arith.constant 0 : index
    %13 = vector.load %arg5[%c0_9, %c0_10] : memref<128x128xbf16, #tpu.memory_space<vmem>>, vector<128x128xbf16>
    %cst_11 = arith.constant dense<0.000000e+00> : vector<16x128xf32>
    %14 = tpu.matmul %12, %13, %cst_11 {dimension_numbers = #tpu.dot_dimension_numbers<[1], [0], [0], [1], [0, 0, 1, 1], [], []>} : vector<16x128xbf16>, vector<128x128xbf16>, vector<16x128xf32> -> vector<16x128xf32>
    %15 = arith.addf %11, %14 : vector<16x128xf32>
    %c0_12 = arith.constant 0 : index
    %c0_13 = arith.constant 0 : index
    %16 = vector.load %arg8[%c0_12, %c0_13] : memref<16x128xf32, #tpu.memory_space<vmem>>, vector<16x128xf32>
    tpu.vector_store %arg8[%c0_12, %c0_13], %15 {strides = array<i32>} : memref<16x128xf32, #tpu.memory_space<vmem>>, vector<16x128xf32>,
    %c0_i32_14 = arith.constant 0 : i32
    %17 = arith.cmpi eq, %arg1, %c0_i32_14 : i32
    %18 = arith.extui %17 : i1 to i32
    %c0_i32_15 = arith.constant 0 : i32
    %19 = arith.cmpi ne, %18, %c0_i32_15 : i32
    scf.if %19 {
      %c0_16 = arith.constant 0 : index
      %c0_17 = arith.constant 0 : index
      %20 = vector.load %arg8[%c0_16, %c0_17] : memref<16x128xf32, #tpu.memory_space<vmem>>, vector<16x128xf32>
      %c0_18 = arith.constant 0 : index
      %c0_19 = arith.constant 0 : index
      %21 = vector.load %arg7[%c0_18, %c0_19] : memref<16x128xf32, #tpu.memory_space<vmem>>, vector<16x128xf32>
      tpu.vector_store %arg7[%c0_18, %c0_19], %20 {strides = array<i32>} : memref<16x128xf32, #tpu.memory_space<vmem>>, vector<16x128xf32>,
    } else {
    }
    return
  }
  func.func @transform_0(%arg0: i32, %arg1: i32) -> (i32, i32) {
    %c0_i32 = arith.constant 0 : i32
    %c0_i32_0 = arith.constant 0 : i32
    return %arg0, %c0_i32 : i32, i32
  }
  func.func @transform_1(%arg0: i32, %arg1: i32) -> (i32, i32) {
    %c0_i32 = arith.constant 0 : i32
    %c0_i32_0 = arith.constant 0 : i32
    return %c0_i32, %arg1 : i32, i32
  }
  func.func @transform_2(%arg0: i32, %arg1: i32) -> (i32, i32) {
    %c0_i32 = arith.constant 0 : i32
    %c0_i32_0 = arith.constant 0 : i32
    return %c0_i32, %arg1 : i32, i32
  }
  func.func @transform_3(%arg0: i32, %arg1: i32) -> (i32, i32) {
    %c0_i32 = arith.constant 0 : i32
    %c0_i32_0 = arith.constant 0 : i32
    return %arg1, %c0_i32 : i32, i32
  }
  func.func @transform_4(%arg0: i32, %arg1: i32) -> (i32, i32) {
    %c0_i32 = arith.constant 0 : i32
    %c0_i32_0 = arith.constant 0 : i32
    %c0_i32_1 = arith.constant 0 : i32
    return %c0_i32, %c0_i32_0 : i32, i32
  }
  func.func @transform_5(%arg0: i32, %arg1: i32) -> (i32, i32) {
    %c0_i32 = arith.constant 0 : i32
    %c0_i32_0 = arith.constant 0 : i32
    return %arg0, %c0_i32 : i32, i32
  }
}

</mosaic_0001>

<bundles_post_ra>
// kernel: feed_forward.1
= control target key start
LH: loop header
LB: loop body
LE: loop exit
PB: predicated region body
PF: predicated region fallthrough
CT: control target
= control target key end

     0   :  { %v375_v0 = vmov 0.0   ;;  %vm376_vm0 = vmmov 0   ;;  %s470_s1 = inlined_call_operand.vmem [shape: bf16[128,128], index: 1, kind: input, shape index: {}]   ;;  %s471_s3 = inlined_call_operand.vmem [shape: bf16[128,128], index: 3, kind: input, shape index: {}]   ;;  %s472_s0 = inlined_call_operand.vmem [shape: bf16[16,128], index: 0, kind: input, shape index: {}]   ;;  %s473_s2 = inlined_call_operand.vmem [shape: f32[1,128], index: 2, kind: input, shape index: {}]   ;;  %s474_s4 = inlined_call_operand.vmem [shape: f32[1,128], index: 4, kind: input, shape index: {}]   ;;  %s475_s5 = inlined_call_operand.vmem [shape: f32[16,128], index: 5, kind: output, shape index: {}]  }
   0x1   :  { %316 = vmatprep.subr.bf16.mxu0 %v375_v0  ;;  %v358_v1 = vld [vmem:[%s470_s1] sm:$0xff]   ;;  %332 = vmatprep.mubr.msk.bf16.mxu0 %vm376_vm0, %v375_v0  ;;  %v359_v2 = vld [vmem:[%s470_s1 + $0x8] sm:$0xff]   ;;  %v360_v3 = vld [vmem:[%s470_s1 + $0x10] sm:$0xff]  }
   0x2   :  { %336 = vmatprep.subr.bf16.mxu1 %v375_v0  ;;  %352 = vmatprep.mubr.msk.bf16.mxu1 %vm376_vm0, %v375_v0  ;;  %v367_v4 = vld [vmem:[%s471_s3] sm:$0xff]   ;;  %v361_v5 = vld [vmem:[%s470_s1 + $0x18] sm:$0xff]   ;;  %v368_v6 = vld [vmem:[%s471_s3 + $0x8] sm:$0xff]  }
   0x3   :  { %317 = vmatpush3.bf16.msra.mxu0 %v358_v1  ;;  %337 = vmatpush3.bf16.msra.mxu1 %v367_v4  ;;  %v362_v7 = vld [vmem:[%s470_s1 + $0x20] sm:$0xff]   ;;  %v369_v8 = vld [vmem:[%s471_s3 + $0x10] sm:$0xff]   ;;  %v363_v9 = vld [vmem:[%s470_s1 + $0x28] sm:$0xff]  }
   0x4   :  { %318 = vmatprep.subr.bf16.mxu0 %v375_v0  ;;  %338 = vmatprep.subr.bf16.mxu1 %v375_v0  ;;  %v370_v10 = vld [vmem:[%s471_s3 + $0x18] sm:$0xff]   ;;  %v364_v11 = vld [vmem:[%s470_s1 + $0x30] sm:$0xff]   ;;  %v371_v12 = vld [vmem:[%s471_s3 + $0x20] sm:$0xff]  }
   0x5   :  { %v365_v13 = vld [vmem:[%s470_s1 + $0x38] sm:$0xff]   ;;  %v372_v14 = vld [vmem:[%s471_s3 + $0x28] sm:$0xff]   ;;  %v366_v15 = vld [vmem:[%s472_s0] sm:$0xff]  }
   0x6   :  { %v373_v16 = vld [vmem:[%s471_s3 + $0x30] sm:$0xff]   ;;  %v374_v17 = vld [vmem:[%s471_s3 + $0x38] sm:$0xff]   ;;  %v280_v18 = vld [vmem:[%s473_s2] ss:$0 sm:$0xff] }
   0x7   :  { %319 = vmatpush3.bf16.msra.mxu0 %v359_v2  ;;  %339 = vmatpush3.bf16.msra.mxu1 %v368_v6  ;;  %v279_v28 = vld [vmem:[%s474_s4] ss:$0 sm:$0xff] }
   0x8   :  { %320 = vmatprep.subr.bf16.mxu0 %v375_v0  ;;  %340 = vmatprep.subr.bf16.mxu1 %v375_v0 }
   0xb   :  { %321 = vmatpush3.bf16.msra.mxu0 %v360_v3  ;;  %341 = vmatpush3.bf16.msra.mxu1 %v369_v8 }
   0xc   :  { %322 = vmatprep.subr.bf16.mxu0 %v375_v0  ;;  %342 = vmatprep.subr.bf16.mxu1 %v375_v0 }
   0xf   :  { %323 = vmatpush3.bf16.msra.mxu0 %v361_v5  ;;  %343 = vmatpush3.bf16.msra.mxu1 %v370_v10 }
  0x10   :  { %324 = vmatprep.subr.bf16.mxu0 %v375_v0  ;;  %344 = vmatprep.subr.bf16.mxu1 %v375_v0 }
  0x13   :  { %325 = vmatpush3.bf16.msra.mxu0 %v362_v7  ;;  %345 = vmatpush3.bf16.msra.mxu1 %v371_v12 }
  0x14   :  { %326 = vmatprep.subr.bf16.mxu0 %v375_v0  ;;  %346 = vmatprep.subr.bf16.mxu1 %v375_v0 }
  0x17   :  { %327 = vmatpush3.bf16.msra.mxu0 %v363_v9  ;;  %347 = vmatpush3.bf16.msra.mxu1 %v372_v14 }
  0x18   :  { %328 = vmatprep.subr.bf16.mxu0 %v375_v0  ;;  %348 = vmatprep.subr.bf16.mxu1 %v375_v0 }
  0x1b   :  { %329 = vmatpush3.bf16.msra.mxu0 %v364_v11  ;;  %349 = vmatpush3.bf16.msra.mxu1 %v373_v16 }
  0x1c   :  { %330 = vmatprep.subr.bf16.mxu0 %v375_v0  ;;  %350 = vmatprep.subr.bf16.mxu1 %v375_v0 }
  0x1f   :  { %331 = vmatpush3.bf16.msra.mxu0 %v365_v13  ;;  %351 = vmatpush3.bf16.msra.mxu1 %v374_v17 }
  0x22   :  { %333 = vmatmul.mubr.bf16.vlgmr.msra.gmra.mrb[0].mxu0 %v366_v15 }
  0xf5   :  { %v147_v19 = vpop.f32.mrb[0].mxu0 }
  0xf6   :  { %v148_v20 = vadd.f32 %v280_v18, %v147_v19  ;;  %v334_v21 = vpop.f32.mrb[1].mxu0 }
  0xf7   :  { %v150_v22 = vpop.f32.mrb[2].mxu0 }
  0xf8   :  { %v151_v23 = vadd.f32 %v280_v18, %v150_v22  ;;  %v335_v24 = vpop.f32.mrb[3].mxu0  ;;  %v154_v25 = vmax.f32 %v148_v20, 0.0 }
  0xfa   :  { %v155_v26 = vmax.f32 %v151_v23, 0.0 }
  0xfc   :  { %v158_v27 = vpack.c.bf16 %v155_v26, %v154_v25 }
  0xfe   :  { %353 = vmatmul.mubr.bf16.vlgmr.msra.gmra.mrb[0].mxu1 %v158_v27 }
 0x1d1   :  { %v257_v29 = vpop.f32.mrb[0].mxu1 }
 0x1d2   :  { %v264_v30 = vadd.f32 %v279_v28, %v257_v29  ;;  %v354_v31 = vpop.f32.mrb[1].mxu1 }
 0x1d3   :  { %v260_v32 = vpop.f32.mrb[2].mxu1 }
 0x1d4   :  { %273 = vst [vmem:[%s475_s5] sm:$0xff] %v264_v30  ;;  %v265_v33 = vadd.f32 %v279_v28, %v260_v32  ;;  %v355_v34 = vpop.f32.mrb[3].mxu1 }
 0x1d6   :  { %274 = vst [vmem:[%s475_s5 + $0x8] sm:$0xff] %v265_v33 }

</bundles_post_ra>
